<compile_context>
chip_gen: v7x
topology: tpu7x:2x2x1
jax: 0.10.0
libtpu: 0.0.40
codegen_flags: <defaults>
</compile_context>

<pallas_src>
import functools

import numpy as np
import jax
import jax.numpy as jnp
from jax import lax
from jax.experimental import pallas as pl
from jax.experimental.pallas import tpu as pltpu

NEG_SLOPE = 0.01   # nn.LeakyReLU default
BN_EPS = 1e-5      # nn.BatchNorm2d default


# --------------------------------------------------------------------------
# pltpu.roll convention probe (one tiny kernel, cached).
# The conv taps need result[:, p] = a[:, (p + s) % L]; depending on the roll
# direction convention that is shift = -s or shift = +s. Resolving it once
# empirically keeps the kernel correct across JAX/Mosaic versions.
# Must be called outside jit (it concretizes the probe result).
# --------------------------------------------------------------------------
@functools.lru_cache(maxsize=None)
def _roll_sign():
    x = jnp.arange(8 * 128, dtype=jnp.float32).reshape(8, 128)

    def probe(x_ref, o_ref):
        o_ref[...] = pltpu.roll(x_ref[...], shift=1, axis=1)

    y = pl.pallas_call(
        probe,
        out_shape=jax.ShapeDtypeStruct((8, 128), jnp.float32),
        in_specs=[pl.BlockSpec(memory_space=pltpu.MemorySpace.VMEM)],
        out_specs=pl.BlockSpec(memory_space=pltpu.MemorySpace.VMEM),
    )(x)
    # np.roll semantics: y[0, 1] == x[0, 0] == 0.0  ->  use shift = (-s) % L.
    return -1 if float(y[0, 1]) == 0.0 else 1


# --------------------------------------------------------------------------
# Fused decoder kernel.
# --------------------------------------------------------------------------
def _decoder_kernel(x_ref, mask_ref, *refs, num_hidden, W, L, roll_sign):
    """Whole decoder on VMEM-resident data.

    x_ref:    (Cin_pad, L) f32   input, channels x flattened(N, H, W)
    mask_ref: (9, L)       f32   0/1 SAME-padding boundary masks per tap
    refs:     per hidden layer: w (Cout, 9*Cin) bf16, b (Cout, 1) f32,
              gamma (Cout, 1) f32, beta (Cout, 1) f32;
              then w_out (D, 9*Cin) bf16, b_out (D, 1) f32; then the output.
    """
    out_ref = refs[-1]
    p_refs = refs[:-1]
    masks = mask_ref[...]                                      # (9, L) f32

    def conv3x3(a, w_ref, b_ref, apply_lrelu):
        # a: (Cin, L) f32. Tap t=(dy,dx) reads a[:, p + dy*W + dx]; reads that
        # fall outside the image (or into a neighboring batch element) are
        # zeroed by the precomputed mask. Rolls ride the XLU; the conv itself
        # is a single bf16 MXU matmul with K = 9*Cin.
        taps = []
        t = 0
        for ddy in (-1, 0, 1):
            for ddx in (-1, 0, 1):
                s = ddy * W + ddx
                if s == 0:
                    taps.append(a)                             # center tap, mask == 1
                else:
                    shifted = pltpu.roll(a, shift=(roll_sign * s) % L, axis=1)
                    taps.append(shifted * masks[t:t + 1, :])
                t += 1
        col = jnp.concatenate(taps, axis=0).astype(jnp.bfloat16)   # (9*Cin, L)
        y = jnp.dot(w_ref[...], col, preferred_element_type=jnp.float32)
        y = y + b_ref[...]                                     # (Cout, L)
        if apply_lrelu:
            y = jnp.where(y >= 0.0, y, NEG_SLOPE * y)
        return y

    a = x_ref[...]
    idx = 0
    for _ in range(num_hidden):
        w_ref, b_ref, g_ref, be_ref = p_refs[idx:idx + 4]
        idx += 4
        y = conv3x3(a, w_ref, b_ref, apply_lrelu=True)
        # BatchNorm2d (training mode): batch stats over N*H*W, biased variance.
        mean = jnp.mean(y, axis=1, keepdims=True)              # (C, 1)
        var = jnp.mean((y - mean) ** 2, axis=1, keepdims=True)
        a = (y - mean) * lax.rsqrt(var + BN_EPS) * g_ref[...] + be_ref[...]
    w_ref, b_ref = p_refs[idx], p_refs[idx + 1]
    out_ref[...] = conv3x3(a, w_ref, b_ref, apply_lrelu=False).astype(out_ref.dtype)


# --------------------------------------------------------------------------
# Host-side packing helpers + public wrapper (NCHW in / NCHW out).
# --------------------------------------------------------------------------
def _boundary_masks(N, H, W):
    """(9, N*H*W) 0/1 masks: mask[t, p] == 1 iff tap t of the 3x3 SAME conv at
    output pixel p reads an in-image pixel of the same batch element."""
    hh, ww = np.meshgrid(np.arange(H), np.arange(W), indexing="ij")
    rows = []
    for ddy in (-1, 0, 1):
        for ddx in (-1, 0, 1):
            m = ((hh + ddy >= 0) & (hh + ddy < H) &
                 (ww + ddx >= 0) & (ww + ddx < W)).astype(np.float32)
            rows.append(np.tile(m.reshape(-1), N))
    return jnp.asarray(np.stack(rows, axis=0))


def _pack_conv_weight(w, cin_pad=None):
    """HWIO (3,3,Cin,Cout) -> (Cout, 9*Cin[_pad]) bf16 matmul weight, matching
    the kernel's (dy, dx, cin) im2col row order."""
    _, _, cin, cout = w.shape
    if cin_pad is not None and cin_pad > cin:
        w = jnp.pad(w, ((0, 0), (0, 0), (0, cin_pad - cin), (0, 0)))
    return jnp.transpose(w, (3, 0, 1, 2)).reshape(cout, -1).astype(jnp.bfloat16)


def basic_decoder_forward(x_nchw, params, num_hidden_layers=3):
    """BasicDecoder forward: (N, 3, H, W) f32 -> (N, D, H, W) f32."""
    N, Cin, H, W = x_nchw.shape
    D = params["w_out"].shape[-1]
    L = N * H * W
    cin_pad = -(-Cin // 8) * 8          # pad input channels to a sublane multiple
    roll_sign = _roll_sign()

    # NCHW -> channels x flattened(batch, H, W); zero-pad the channel rows.
    x2d = jnp.transpose(x_nchw, (1, 0, 2, 3)).reshape(Cin, L).astype(jnp.float32)
    x2d = jnp.pad(x2d, ((0, cin_pad - Cin), (0, 0)))

    args = [x2d, _boundary_masks(N, H, W)]
    for i in range(num_hidden_layers):
        args += [
            _pack_conv_weight(params[f"w{i}"], cin_pad if i == 0 else None),
            params[f"b{i}"].reshape(-1, 1).astype(jnp.float32),
            params[f"gamma{i}"].reshape(-1, 1).astype(jnp.float32),
            params[f"beta{i}"].reshape(-1, 1).astype(jnp.float32),
        ]
    args += [
        _pack_conv_weight(params["w_out"]),
        params["b_out"].reshape(-1, 1).astype(jnp.float32),
    ]

    kernel = functools.partial(
        _decoder_kernel, num_hidden=num_hidden_layers, W=W, L=L,
        roll_sign=roll_sign)

    out2d = pl.pallas_call(
        kernel,
        out_shape=jax.ShapeDtypeStruct((D, L), jnp.float32),
        in_specs=[pl.BlockSpec(memory_space=pltpu.MemorySpace.VMEM)] * len(args),
        out_specs=pl.BlockSpec(memory_space=pltpu.MemorySpace.VMEM),
    )(*args)

    # (D, N*H*W) -> (N, D, H, W): a few-KB reshape/transpose.
    return jnp.transpose(out2d.reshape(D, N, H, W), (1, 0, 2, 3))


# --------------------------------------------------------------------------
# Plain-JAX reference (same bf16-operand / f32-accumulate numerics).
# --------------------------------------------------------------------------
def _ref_forward(x_nchw, params, num_hidden_layers=3):
    x = jnp.transpose(x_nchw, (0, 2, 3, 1)).astype(jnp.float32)

    def conv(x, w, b):
        y = lax.conv_general_dilated(
            x.astype(jnp.bfloat16), w.astype(jnp.bfloat16), (1, 1), "SAME",
            dimension_numbers=("NHWC", "HWIO", "NHWC"),
            preferred_element_type=jnp.float32)
        return y + b

    for i in range(num_hidden_layers):
        x = conv(x, params[f"w{i}"], params[f"b{i}"])
        x = jnp.where(x >= 0.0, x, NEG_SLOPE * x)
        mean = jnp.mean(x, axis=(0, 1, 2), keepdims=True)
        var = jnp.mean((x - mean) ** 2, axis=(0, 1, 2), keepdims=True)
        x = (x - mean) * lax.rsqrt(var + BN_EPS) \
            * params[f"gamma{i}"] + params[f"beta{i}"]
    x = conv(x, params["w_out"], params["b_out"])
    return jnp.transpose(x, (0, 3, 1, 2))


def make_params(key, data_depth, hidden_size, layers):
    """Deterministic synthetic init (uniform +-1/sqrt(fan_in), like PyTorch)."""
    params = {}
    cin = 3
    for i in range(layers):
        key, kw, kb, kg, kbe = jax.random.split(key, 5)
        bound = 1.0 / np.sqrt(cin * 9)
        params[f"w{i}"] = jax.random.uniform(
            kw, (3, 3, cin, hidden_size), jnp.float32, -bound, bound)
        params[f"b{i}"] = jax.random.uniform(
            kb, (hidden_size,), jnp.float32, -bound, bound)
        params[f"gamma{i}"] = 1.0 + 0.1 * jax.random.normal(kg, (hidden_size,), jnp.float32)
        params[f"beta{i}"] = 0.1 * jax.random.normal(kbe, (hidden_size,), jnp.float32)
        cin = hidden_size
    key, kw, kb = jax.random.split(key, 3)
    bound = 1.0 / np.sqrt(cin * 9)
    params["w_out"] = jax.random.uniform(
        kw, (3, 3, cin, data_depth), jnp.float32, -bound, bound)
    params["b_out"] = jax.random.uniform(
        kb, (data_depth,), jnp.float32, -bound, bound)
    return params


if __name__ == "__main__":
    data_depth = 4
    hidden_size = 32
    layers = 3
    N, H, W = 2, 16, 16

    key = jax.random.PRNGKey(0)
    key, kx = jax.random.split(key)
    x = jax.random.normal(kx, (N, 3, H, W), jnp.float32)     # NCHW like PyTorch
    params = make_params(key, data_depth, hidden_size, layers)

    out = basic_decoder_forward(x, params, num_hidden_layers=layers)
    out = jax.block_until_ready(out)
    assert out.shape == (N, data_depth, H, W), out.shape

    ref = jax.block_until_ready(_ref_forward(x, params, num_hidden_layers=layers))
    np.testing.assert_allclose(np.asarray(out), np.asarray(ref), atol=1e-2, rtol=1e-2)

    print("KERNEL_OK")
</pallas_src>

<mosaic_0001>
module attributes {stable_mosaic.version = 11 : i64} {
  func.func @probe(%arg0: memref<8x128xf32, #tpu.memory_space<vmem>>, %arg1: memref<8x128xf32, #tpu.memory_space<vmem>>) attributes {dimension_semantics = [], scalar_prefetch = 0 : i64, scratch_operands = 0 : i64, tpu.core_type = #tpu.core_type<tc>} {
    %c0 = arith.constant 0 : index
    %c0_0 = arith.constant 0 : index
    %0 = vector.load %arg0[%c0, %c0_0] : memref<8x128xf32, #tpu.memory_space<vmem>>, vector<8x128xf32>
    %c1_i32 = arith.constant 1 : i32
    %1 = tpu.dynamic_rotate %0 by %c1_i32 dim 1 : vector<8x128xf32>, i32 -> vector<8x128xf32>
    %c0_1 = arith.constant 0 : index
    %c0_2 = arith.constant 0 : index
    %2 = vector.load %arg1[%c0_1, %c0_2] : memref<8x128xf32, #tpu.memory_space<vmem>>, vector<8x128xf32>
    tpu.vector_store %arg1[%c0_1, %c0_2], %1 {strides = array<i32>} : memref<8x128xf32, #tpu.memory_space<vmem>>, vector<8x128xf32>,
    return
  }
}

</mosaic_0001>

<bundles_post_ra>
// kernel: tpu_custom_call.1
= control target key start
LH: loop header
LB: loop body
LE: loop exit
PB: predicated region body
PF: predicated region fallthrough
CT: control target
= control target key end

     0   :  { %6 = vsyncpa [#allocation3], 0  ;;  %s128_s0 = inlined_call_operand.hbm [shape: f32[8,128], index: 0, kind: input, shape index: {}]   ;;  %s129_s1 = inlined_call_operand.hbm [shape: f32[8,128], index: 1, kind: output, shape index: {}]  }
   0x1   :  { %7 = vsyncpa [#allocation4], 0  ;;  %s91_s6 = smov [#allocation2]   ;;  %s43_s10 = scalar_lea.hbm %s128_s0, 128 }
   0x2   :  { %s14_s7 = sshll.u32 %s91_s6, 4  ;;  %p44_p0 = scmp.ne.s32.totalorder %s128_s0, %s43_s10  ;;  %s15_s7 = int_to_ptr.vmem [resolvable:$true] %s14_s7 }
   0x3   :  { %p47_p1 = scmp.lt.u32.totalorder %s43_s10, %s128_s0 }
   0x5   :  { %p49_p2 = pnand %p47_p1, %p44_p0 }
   0x7   :  { %52 = shalt.err (!%p49_p2)
}
   0x8   :  { %s53_s15 = scalar_lea.vmem %s15_s7, 128  ;;  %p58_p4 = scmp.lt.s32.totalorder %s15_s7, %s15_s7 }
   0x9   :  { %p54_p3 = scmp.ne.s32.totalorder %s15_s7, %s53_s15  ;;  %p59_p5 = scmp.lt.s32.totalorder %s53_s15, %s53_s15 }
   0xb   :  { %p60_p6 = por %p59_p5, %p58_p4 }
   0xd   :  { %p61_p7 = pnand %p60_p6, %p54_p3 }
   0xf   :  { %64 = shalt.err (!%p61_p7)
}
  0x10   :  { %17 = dma.hbm_to_vmem [thread:$0]  %s128_s0, 128, %s15_s7, [#allocation3]  }
  0x11   :  { %87 = dma.done.wait [#allocation3], 128  }
  0x12   :  { %88 = vsyncadd [#allocation3], 4294967168  ;;  %v21_v0 = vld [vmem:[#allocation2] sm:$0xff]  ;;  %s92_s18 = smov 1   ;;  %s93_s19 = smov [#allocation5]  }
  0x13   :  { %22 = vrot.lane.b32.xlu0 %v21_v0, %s92_s18  ;;  %s31_s20 = sshll.u32 %s93_s19, 4  ;;  %s32_s20 = int_to_ptr.vmem [resolvable:$true] %s31_s20 }
  0x14   :  { %s65_s21 = scalar_lea.vmem %s32_s20, 128  ;;  %p70_p9 = scmp.lt.s32.totalorder %s32_s20, %s32_s20 }
  0x15   :  { %p66_p8 = scmp.ne.s32.totalorder %s32_s20, %s65_s21  ;;  %p71_p10 = scmp.lt.s32.totalorder %s65_s21, %s65_s21 }
  0x17   :  { %p72_p11 = por %p71_p10, %p70_p9 }
  0x19   :  { %p73_p12 = pnand %p72_p11, %p66_p8 }
  0x85   :  { %v23_v1 = vpop.permute.xlu0 %22 }
  0x86   :  { %24 = vst [vmem:[#allocation5] sm:$0xff] %v23_v1 }
  0x87   :  { %76 = shalt.err (!%p73_p12)
}
  0x88   :  { %s77_s0 = scalar_lea.hbm %s129_s1, 128 }
  0x89   :  { %p78_p13 = scmp.ne.s32.totalorder %s129_s1, %s77_s0  ;;  %p81_p0 = scmp.lt.u32.totalorder %s77_s0, %s129_s1 }
  0x8b   :  { %p83_p1 = pnand %p81_p0, %p78_p13 }
  0x8d   :  { %86 = shalt.err (!%p83_p1)
}
  0x8e   :  { %34 = dma.vmem_to_hbm [thread:$0]  %s32_s20, 128, %s129_s1, [#allocation4]  }
  0x8f   :  { %89 = dma.done.wait [#allocation4], 128  }
  0x90   :  { %90 = vsyncadd [#allocation4], 4294967168 }
  0x91   :  { %38 = vsyncpa [#allocation3], 1 }
  0x92   :  { %39 = vsyncpa [#allocation4], 1 }

</bundles_post_ra>
